<compile_context>
chip_gen: v7x
topology: tpu7x:2x2x1
jax: 0.10.0
libtpu: 0.0.40
codegen_flags: <defaults>
</compile_context>

<pallas_src>
import jax
import jax.numpy as jnp
from jax.experimental import pallas as pl
from jax.experimental.pallas import tpu as pltpu


def _round_up(x, m):
    return ((x + m - 1) // m) * m


def _make_matmul_stats_kernel(tm, cout_pad, m_valid, m_pad, add_relu, emit_stats):
    """Pass 1: (TM,TK)x(TK,Cout_pad) MXU matmul with f32 accumulator.

    On the last K step: add conv bias, (optionally) ReLU, write the (TM, Cout_pad)
    output tile and, if emit_stats, the per-channel sum / sum-of-squares of this
    M tile (padded rows masked out) for the cross-tile BatchNorm reduction.
    """

    def kernel(p_ref, w_ref, b_ref, *refs):
        if emit_stats:
            y_ref, stats_ref, acc_ref = refs
        else:
            y_ref, acc_ref = refs

        kk = pl.program_id(1)

        @pl.when(kk == 0)
        def _():
            acc_ref[...] = jnp.zeros_like(acc_ref)

        acc_ref[...] += jnp.dot(
            p_ref[...], w_ref[...], preferred_element_type=jnp.float32
        )

        @pl.when(kk == pl.num_programs(1) - 1)
        def _():
            # Epilogue only on the last K iteration (bias/stats not re-done per K step).
            y = acc_ref[...] + b_ref[...]  # conv bias (zeros when bias=False)
            if add_relu:
                y = jnp.maximum(y, 0.0)
            y_ref[...] = y.astype(y_ref.dtype)
            if emit_stats:
                if m_pad != m_valid:
                    # Mask rows that are pure M padding out of the batch statistics.
                    row = pl.program_id(0) * tm + jax.lax.broadcasted_iota(
                        jnp.int32, (tm, cout_pad), 0
                    )
                    ym = jnp.where(row < m_valid, y, 0.0)
                else:
                    ym = y
                s = jnp.sum(ym, axis=0, keepdims=True)        # (1, Cout_pad)
                ss = jnp.sum(ym * ym, axis=0, keepdims=True)  # (1, Cout_pad)
                rid = jax.lax.broadcasted_iota(jnp.int32, (8, cout_pad), 0)
                blk = jnp.where(rid == 0, s, jnp.where(rid == 1, ss, 0.0))
                stats_ref[...] = blk[None, :, :]

    return kernel


def _make_affine_relu_kernel(add_relu):
    """Pass 2: streaming y*scale + shift (+ ReLU), lane-dense blocks."""

    def kernel(y_ref, scale_ref, shift_ref, o_ref):
        y = y_ref[...] * scale_ref[...] + shift_ref[...]
        if add_relu:
            y = jnp.maximum(y, 0.0)
        o_ref[...] = y.astype(o_ref.dtype)

    return kernel


def _im2col_nhwc(x_pad, kh, kw, stride, dilation, h_out, w_out):
    # (N, Hp, Wp, Cin) -> (N, H_out, W_out, kh*kw*Cin); glue only, stays in bf16.
    # TODO(synk): implicit im2col (grid axis over the kh*kw taps indexing the padded NHWC
    # input directly) would remove this kh*kw HBM blowup; for now patches are emitted in bf16.
    cols = []
    for i in range(kh):
        for j in range(kw):
            di, dj = i * dilation, j * dilation
            cols.append(
                x_pad[
                    :,
                    di : di + (h_out - 1) * stride + 1 : stride,
                    dj : dj + (w_out - 1) * stride + 1 : stride,
                    :,
                ]
            )
    return jnp.concatenate(cols, axis=-1)


class BasicConvPallas:
    """JAX/Pallas port of lib/ssd/fssd.py::BasicConv (training-mode BatchNorm)."""

    def __init__(
        self,
        in_planes,
        out_planes,
        kernel_size,
        stride=1,
        padding=0,
        dilation=1,
        groups=1,
        relu=True,
        bn=True,
        bias=False,
        tile_m=256,   # raise to 512-1024 on v7x, 1024-2048 on v6e for large layers
        tile_k=512,
        key=None,
    ):
        assert groups == 1  # TODO(synk): grouped convolution not implemented
        self.in_planes = in_planes
        self.out_channels = out_planes
        self.kh = self.kw = kernel_size
        self.stride = stride
        self.padding = padding
        self.dilation = dilation
        self.use_relu = relu
        self.use_bn = bn
        self.use_bias = bias
        self.eps = 1e-5
        self.tile_m = tile_m
        self.tile_k = tile_k

        if key is None:
            key = jax.random.PRNGKey(0)
        kw_, kb_, kg_, kbe_ = jax.random.split(key, 4)
        fan_in = in_planes * self.kh * self.kw
        # Deterministic synthetic parameters (PyTorch weight layout: Cout,Cin,kh,kw).
        self.weight = (
            jax.random.normal(kw_, (out_planes, in_planes, self.kh, self.kw), jnp.float32)
            / jnp.sqrt(jnp.float32(fan_in))
        )
        self.bias = (
            0.05 * jax.random.normal(kb_, (out_planes,), jnp.float32)
            if bias
            else jnp.zeros((out_planes,), jnp.float32)
        )
        self.gamma = 1.0 + 0.1 * jax.random.normal(kg_, (out_planes,), jnp.float32)
        self.beta = 0.1 * jax.random.normal(kbe_, (out_planes,), jnp.float32)

    def __call__(self, x_nchw, up_size=None):
        n, cin, h, w = x_nchw.shape
        assert cin == self.in_planes
        kh, kw, s, p, d = self.kh, self.kw, self.stride, self.padding, self.dilation
        h_out = (h + 2 * p - d * (kh - 1) - 1) // s + 1
        w_out = (w + 2 * p - d * (kw - 1) - 1) // s + 1
        cout = self.out_channels

        m = n * h_out * w_out
        k = kh * kw * cin
        # Lane-dense padding of the channel (lane) and contraction dims.
        cout_pad = _round_up(cout, 128)
        k_pad = _round_up(k, 128)
        tk = min(self.tile_k, k_pad)
        k_pad = _round_up(k_pad, tk)
        tm = min(self.tile_m, _round_up(m, 16))
        m_pad = _round_up(m, tm)
        num_m = m_pad // tm
        num_k = k_pad // tk

        # --- glue: layout + im2col (bf16 halves HBM/VMEM bytes into the MXU) ---
        x = jnp.transpose(x_nchw, (0, 2, 3, 1)).astype(jnp.bfloat16)  # NHWC
        x = jnp.pad(x, ((0, 0), (p, p), (p, p), (0, 0)))
        patches = _im2col_nhwc(x, kh, kw, s, d, h_out, w_out)  # (N,Ho,Wo, kh*kw*Cin)
        patches2d = patches.reshape(m, k)
        patches2d = jnp.pad(patches2d, ((0, m_pad - m), (0, k_pad - k)))

        # weight (Cout,Cin,kh,kw) -> (kh,kw,Cin,Cout) -> (K,Cout), padded, bf16.
        w2d = jnp.transpose(self.weight, (2, 3, 1, 0)).reshape(k, cout)
        w2d = jnp.pad(w2d, ((0, k_pad - k), (0, cout_pad - cout))).astype(jnp.bfloat16)
        b2d = jnp.pad(self.bias, (0, cout_pad - cout)).reshape(1, cout_pad)

        cparams1 = pltpu.CompilerParams(
            dimension_semantics=("parallel", "arbitrary"),
            vmem_limit_bytes=48 * 1024 * 1024,
        )

        fuse_relu_in_pass1 = self.use_relu and not self.use_bn
        kernel1 = _make_matmul_stats_kernel(
            tm, cout_pad, m, m_pad, add_relu=fuse_relu_in_pass1, emit_stats=self.use_bn
        )

        in_specs = [
            pl.BlockSpec((tm, tk), lambda i, kk: (i, kk)),
            pl.BlockSpec((tk, cout_pad), lambda i, kk: (kk, 0)),
            pl.BlockSpec((1, cout_pad), lambda i, kk: (0, 0)),
        ]
        if self.use_bn:
            out_shape = (
                jax.ShapeDtypeStruct((m_pad, cout_pad), jnp.float32),
                jax.ShapeDtypeStruct((num_m, 8, cout_pad), jnp.float32),
            )
            out_specs = (
                pl.BlockSpec((tm, cout_pad), lambda i, kk: (i, 0)),
                pl.BlockSpec((1, 8, cout_pad), lambda i, kk: (i, 0, 0)),
            )
        else:
            out_shape = jax.ShapeDtypeStruct((m_pad, cout_pad), jnp.float32)
            out_specs = pl.BlockSpec((tm, cout_pad), lambda i, kk: (i, 0))

        res = pl.pallas_call(
            kernel1,
            out_shape=out_shape,
            grid=(num_m, num_k),
            in_specs=in_specs,
            out_specs=out_specs,
            scratch_shapes=[pltpu.VMEM((tm, cout_pad), jnp.float32)],
            compiler_params=cparams1,
        )(patches2d, w2d, b2d)

        if self.use_bn:
            y_pad, stats = res
            # Tiny cross-tile reduction of the batch statistics (glue; a few KB).
            ch_sum = jnp.sum(stats[:, 0, :], axis=0)   # (cout_pad,)
            ch_ssq = jnp.sum(stats[:, 1, :], axis=0)   # (cout_pad,)
            mean = ch_sum / m
            # E[x^2]-mean^2 in f32; clamped at 0 against cancellation (see review note).
            var = jnp.maximum(ch_ssq / m - mean * mean, 0.0)
            gamma_pad = jnp.pad(self.gamma, (0, cout_pad - cout))
            beta_pad = jnp.pad(self.beta, (0, cout_pad - cout))
            scale = gamma_pad * jax.lax.rsqrt(var + self.eps)
            shift = beta_pad - mean * scale

            kernel2 = _make_affine_relu_kernel(self.use_relu)
            out_pad = pl.pallas_call(
                kernel2,
                out_shape=jax.ShapeDtypeStruct((m_pad, cout_pad), jnp.float32),
                grid=(num_m,),
                in_specs=[
                    pl.BlockSpec((tm, cout_pad), lambda i: (i, 0)),
                    pl.BlockSpec((1, cout_pad), lambda i: (0, 0)),
                    pl.BlockSpec((1, cout_pad), lambda i: (0, 0)),
                ],
                out_specs=pl.BlockSpec((tm, cout_pad), lambda i: (i, 0)),
                compiler_params=pltpu.CompilerParams(
                    dimension_semantics=("parallel",),
                    vmem_limit_bytes=48 * 1024 * 1024,
                ),
            )(y_pad, scale.reshape(1, cout_pad), shift.reshape(1, cout_pad))
        else:
            out_pad = res

        out = out_pad[:m, :cout].reshape(n, h_out, w_out, cout)  # NHWC
        if up_size is not None:
            # TODO(synk): PyTorch F.upsample(bilinear) align_corners semantics not
            # replicated exactly; plain-JAX bilinear resize used (glue, no Pallas kernel).
            out = jax.image.resize(
                out, (n, up_size[0], up_size[1], cout), method="bilinear"
            )
        # TODO(synk): keep the surrounding model NHWC end-to-end to avoid this transpose.
        return jnp.transpose(out, (0, 3, 1, 2))  # back to NCHW (PyTorch convention)


def _reference(module: BasicConvPallas, x_nchw):
    # Pure-JAX f32 reference of the module semantics (training-mode BN).
    y = jax.lax.conv_general_dilated(
        x_nchw.astype(jnp.float32),
        module.weight,
        window_strides=(module.stride, module.stride),
        padding=[(module.padding, module.padding)] * 2,
        rhs_dilation=(module.dilation, module.dilation),
        dimension_numbers=("NCHW", "OIHW", "NCHW"),
        precision=jax.lax.Precision.HIGHEST,
    )
    y = y + module.bias.reshape(1, -1, 1, 1)
    if module.use_bn:
        mean = jnp.mean(y, axis=(0, 2, 3), keepdims=True)
        var = jnp.mean((y - mean) ** 2, axis=(0, 2, 3), keepdims=True)
        y = (y - mean) * jax.lax.rsqrt(var + module.eps)
        y = y * module.gamma.reshape(1, -1, 1, 1) + module.beta.reshape(1, -1, 1, 1)
    if module.use_relu:
        y = jnp.maximum(y, 0.0)
    return y


if __name__ == "__main__":
    key = jax.random.PRNGKey(0)
    kx, kp1, kp2 = jax.random.split(key, 3)

    # Small shapes: N=2, Cin=4, H=W=16, Cout=8, 3x3 conv, pad=1  ->  M=512, K=36.
    x = jax.random.normal(kx, (2, 4, 16, 16), jnp.float32)

    # Default BasicConv config (conv + BN + ReLU).  tile_m=256 gives 2 M tiles so the
    # cross-tile BatchNorm statistics reduction path is exercised.
    mod_bn = BasicConvPallas(
        in_planes=4, out_planes=8, kernel_size=3, stride=1, padding=1,
        relu=True, bn=True, bias=False, tile_m=256, key=kp1,
    )
    out = jax.block_until_ready(mod_bn(x))
    assert out.shape == (2, 8, 16, 16), out.shape
    ref = jax.block_until_ready(_reference(mod_bn, x))
    # bf16 MXU operands vs f32 reference -> tolerance loosened accordingly.
    err = float(jnp.max(jnp.abs(out - ref)))
    assert jnp.allclose(out, ref, rtol=2e-2, atol=2e-2), err

    # conv + bias only (no BN / no ReLU): single-pass fused kernel path.
    mod_plain = BasicConvPallas(
        in_planes=4, out_planes=8, kernel_size=3, stride=1, padding=1,
        relu=False, bn=False, bias=True, tile_m=256, key=kp2,
    )
    out2 = jax.block_until_ready(mod_plain(x))
    ref2 = jax.block_until_ready(_reference(mod_plain, x))
    err2 = float(jnp.max(jnp.abs(out2 - ref2)))
    assert jnp.allclose(out2, ref2, rtol=2e-2, atol=2e-2), err2

    print("KERNEL_OK")
</pallas_src>

<mosaic_0001>
module attributes {stable_mosaic.version = 11 : i64} {
  func.func @kernel(%arg0: i32, %arg1: i32, %arg2: memref<256x128xbf16, #tpu.memory_space<vmem>>, %arg3: memref<128x128xbf16, #tpu.memory_space<vmem>>, %arg4: memref<1x128xf32, #tpu.memory_space<vmem>>, %arg5: memref<256x128xf32, #tpu.memory_space<vmem>>, %arg6: memref<1x8x128xf32, #tpu.memory_space<vmem>>, %arg7: memref<256x128xf32, #tpu.memory_space<vmem>>) attributes {dimension_semantics = [#tpu.dimension_semantics<parallel>, #tpu.dimension_semantics<arbitrary>], iteration_bounds = array<i64: 2, 1>, scalar_prefetch = 0 : i64, scratch_operands = 1 : i64, tpu.core_type = #tpu.core_type<tc>, window_params = [{transform_indices = @transform_0, window_bounds = array<i64: 256, 128>}, {transform_indices = @transform_1, window_bounds = array<i64: 128, 128>}, {pipeline_mode = #tpu.pipeline_mode<synchronous>, transform_indices = @transform_2, window_bounds = array<i64: 1, 128>}, {transform_indices = @transform_3, window_bounds = array<i64: 256, 128>}, {transform_indices = @transform_4, window_bounds = array<i64: 1, 8, 128>}]} {
    %c0_i32 = arith.constant 0 : i32
    %0 = arith.cmpi eq, %arg1, %c0_i32 : i32
    %1 = arith.extui %0 : i1 to i32
    %c0_i32_0 = arith.constant 0 : i32
    %2 = arith.cmpi ne, %1, %c0_i32_0 : i32
    scf.if %2 {
      %cst_10 = arith.constant 0.000000e+00 : f32
      %12 = vector.broadcast %cst_10 : f32 to vector<256x128xf32>
      %c0_11 = arith.constant 0 : index
      %c0_12 = arith.constant 0 : index
      %13 = vector.load %arg7[%c0_11, %c0_12] : memref<256x128xf32, #tpu.memory_space<vmem>>, vector<256x128xf32>
      tpu.vector_store %arg7[%c0_11, %c0_12], %12 {strides = array<i32>} : memref<256x128xf32, #tpu.memory_space<vmem>>, vector<256x128xf32>,
    } else {
    }
    %c0 = arith.constant 0 : index
    %c0_1 = arith.constant 0 : index
    %3 = vector.load %arg7[%c0, %c0_1] : memref<256x128xf32, #tpu.memory_space<vmem>>, vector<256x128xf32>
    %c0_2 = arith.constant 0 : index
    %c0_3 = arith.constant 0 : index
    %4 = vector.load %arg2[%c0_2, %c0_3] : memref<256x128xbf16, #tpu.memory_space<vmem>>, vector<256x128xbf16>
    %c0_4 = arith.constant 0 : index
    %c0_5 = arith.constant 0 : index
    %5 = vector.load %arg3[%c0_4, %c0_5] : memref<128x128xbf16, #tpu.memory_space<vmem>>, vector<128x128xbf16>
    %cst = arith.constant dense<0.000000e+00> : vector<256x128xf32>
    %6 = tpu.matmul %4, %5, %cst {dimension_numbers = #tpu.dot_dimension_numbers<[1], [0], [0], [1], [0, 0, 1, 1], [], []>} : vector<256x128xbf16>, vector<128x128xbf16>, vector<256x128xf32> -> vector<256x128xf32>
    %7 = arith.addf %3, %6 : vector<256x128xf32>
    %c0_6 = arith.constant 0 : index
    %c0_7 = arith.constant 0 : index
    %8 = vector.load %arg7[%c0_6, %c0_7] : memref<256x128xf32, #tpu.memory_space<vmem>>, vector<256x128xf32>
    tpu.vector_store %arg7[%c0_6, %c0_7], %7 {strides = array<i32>} : memref<256x128xf32, #tpu.memory_space<vmem>>, vector<256x128xf32>,
    %c0_i32_8 = arith.constant 0 : i32
    %9 = arith.cmpi eq, %arg1, %c0_i32_8 : i32
    %10 = arith.extui %9 : i1 to i32
    %c0_i32_9 = arith.constant 0 : i32
    %11 = arith.cmpi ne, %10, %c0_i32_9 : i32
    scf.if %11 {
      %c0_10 = arith.constant 0 : index
      %c0_11 = arith.constant 0 : index
      %12 = vector.load %arg7[%c0_10, %c0_11] : memref<256x128xf32, #tpu.memory_space<vmem>>, vector<256x128xf32>
      %c0_12 = arith.constant 0 : index
      %c0_13 = arith.constant 0 : index
      %13 = vector.load %arg4[%c0_12, %c0_13] : memref<1x128xf32, #tpu.memory_space<vmem>>, vector<1x128xf32>
      %14 = vector.broadcast %13 : vector<1x128xf32> to vector<256x128xf32>
      %15 = arith.addf %12, %14 : vector<256x128xf32>
      %c0_14 = arith.constant 0 : index
      %c0_15 = arith.constant 0 : index
      %16 = vector.load %arg5[%c0_14, %c0_15] : memref<256x128xf32, #tpu.memory_space<vmem>>, vector<256x128xf32>
      tpu.vector_store %arg5[%c0_14, %c0_15], %15 {strides = array<i32>} : memref<256x128xf32, #tpu.memory_space<vmem>>, vector<256x128xf32>,
      %cst_16 = arith.constant dense<0.000000e+00> : vector<128xf32>
      %17 = vector.multi_reduction <add>, %15, %cst_16 [0] : vector<256x128xf32> to vector<128xf32>
      %18 = vector.shape_cast %17 : vector<128xf32> to vector<1x128xf32>
      %19 = arith.mulf %15, %15 : vector<256x128xf32>
      %cst_17 = arith.constant dense<0.000000e+00> : vector<128xf32>
      %20 = vector.multi_reduction <add>, %19, %cst_17 [0] : vector<256x128xf32> to vector<128xf32>
      %21 = vector.shape_cast %20 : vector<128xf32> to vector<1x128xf32>
      %22 = tpu.iota {dimensions = array<i32: 0>} : vector<8x128xi32>
      %c0_i32_18 = arith.constant 0 : i32
      %23 = vector.broadcast %c0_i32_18 : i32 to vector<8x128xi32>
      %24 = arith.cmpi eq, %22, %23 : vector<8x128xi32>
      %c1_i32 = arith.constant 1 : i32
      %25 = vector.broadcast %c1_i32 : i32 to vector<8x128xi32>
      %26 = arith.cmpi eq, %22, %25 : vector<8x128xi32>
      %cst_19 = arith.constant 0.000000e+00 : f32
      %27 = vector.shape_cast %21 : vector<1x128xf32> to vector<1x128xf32>
      %28 = vector.broadcast %27 : vector<1x128xf32> to vector<8x128xf32>
      %29 = vector.broadcast %cst_19 : f32 to vector<8x128xf32>
      %30 = arith.select %26, %28, %29 : vector<8x128xi1>, vector<8x128xf32>
      %31 = vector.shape_cast %18 : vector<1x128xf32> to vector<1x128xf32>
      %32 = vector.broadcast %31 : vector<1x128xf32> to vector<8x128xf32>
      %33 = arith.select %24, %32, %30 : vector<8x128xi1>, vector<8x128xf32>
      %34 = vector.shape_cast %33 : vector<8x128xf32> to vector<1x8x128xf32>
      %c0_20 = arith.constant 0 : index
      %c0_21 = arith.constant 0 : index
      %c0_22 = arith.constant 0 : index
      %35 = vector.load %arg6[%c0_20, %c0_21, %c0_22] : memref<1x8x128xf32, #tpu.memory_space<vmem>>, vector<1x8x128xf32>
      tpu.vector_store %arg6[%c0_20, %c0_21, %c0_22], %34 {strides = array<i32>} : memref<1x8x128xf32, #tpu.memory_space<vmem>>, vector<1x8x128xf32>,
    } else {
    }
    return
  }
  func.func @transform_0(%arg0: i32, %arg1: i32) -> (i32, i32) {
    %c0_i32 = arith.constant 0 : i32
    return %arg0, %arg1 : i32, i32
  }
  func.func @transform_1(%arg0: i32, %arg1: i32) -> (i32, i32) {
    %c0_i32 = arith.constant 0 : i32
    %c0_i32_0 = arith.constant 0 : i32
    return %arg1, %c0_i32 : i32, i32
  }
  func.func @transform_2(%arg0: i32, %arg1: i32) -> (i32, i32) {
    %c0_i32 = arith.constant 0 : i32
    %c0_i32_0 = arith.constant 0 : i32
    %c0_i32_1 = arith.constant 0 : i32
    return %c0_i32, %c0_i32_0 : i32, i32
  }
  func.func @transform_3(%arg0: i32, %arg1: i32) -> (i32, i32) {
    %c0_i32 = arith.constant 0 : i32
    %c0_i32_0 = arith.constant 0 : i32
    return %arg0, %c0_i32 : i32, i32
  }
  func.func @transform_4(%arg0: i32, %arg1: i32) -> (i32, i32, i32) {
    %c0_i32 = arith.constant 0 : i32
    %c0_i32_0 = arith.constant 0 : i32
    %c0_i32_1 = arith.constant 0 : i32
    return %arg0, %c0_i32, %c0_i32_0 : i32, i32, i32
  }
}

</mosaic_0001>

<bundles_post_ra>
// kernel: tpu_custom_call.1
= control target key start
LH: loop header
LB: loop body
LE: loop exit
PB: predicated region body
PF: predicated region fallthrough
CT: control target
= control target key end

     0   :  { %10 = vsyncpa [#allocation4], 0  ;;  %s2027_s0 = inlined_call_operand.hbm [shape: bf16[512,128], index: 0, kind: input, shape index: {}]   ;;  %s2028_s1 = inlined_call_operand.hbm [shape: bf16[128,128], index: 1, kind: input, shape index: {}]   ;;  %s2029_s2 = inlined_call_operand.vmem [shape: f32[1,128], index: 2, kind: input, shape index: {}]   ;;  %s2030_s3 = inlined_call_operand.hbm [shape: f32[512,128], index: 3, kind: output, shape index: {0}]   ;;  %s2031_s4 = inlined_call_operand.hbm [shape: f32[2,8,128], index: 4, kind: output, shape index: {1}]  }
   0x1   :  { %12 = vsyncpa [#allocation4 + $0x1], 0 }
   0x2   :  { %13 = vsyncpa [#allocation7], 0 }
   0x3   :  { %14 = vsyncpa [#allocation5], 0 }
   0x4   :  { %16 = vsyncpa [#allocation5 + $0x1], 0 }
   0x5   :  { %17 = vsyncpa [#allocation10], 0 }
   0x6   :  { %19 = vsyncpa [#allocation10 + $0x1], 0  ;;  %s1584_s15 = smov 0   ;;  %s1586_s16 = smov 0  }
   0x7   :  { %s1588_s17 = smov 0   ;;  %s1590_s18 = smov 0  }
   0x8   :  { %s1592_s19 = smov 0   ;;  %s1594_s20 = smov 0  }
   0x9 LB: > { %s1132_s21 = sadd.s32 4294967295, %s1549_s20   ;;  %s1133_s22 = sadd.s32 4294967294, %s1549_s20   ;;  %s1549_s20 = sphi %s1594_s20, %s25_s20   ;;  %s1545_s19 = sphi %s1592_s19, %s2055_s19   ;;  %s1541_s18 = sphi %s1590_s18, %s2054_s18   ;;  %s1537_s17 = sphi %s1588_s17, %s2053_s17   ;;  %s1533_s16 = sphi %s1586_s16, %s2052_s16   ;;  %s1529_s15 = sphi %s1584_s15, %s2051_s15  }
   0xa   : > { %p59_p0 = scmp.ne.s32.totalorder %s1533_s16, %s1529_s15  ;;  %p1618_p1 = scmp.eq.s32.totalorder %s1132_s21, 0 }
   0xb   : > { %p1622_p2 = scmp.eq.s32.totalorder %s1132_s21, 1  ;;  %p136_p3 = scmp.eq.s32.totalorder %s1133_s22, 1 }
   0xc   : > { %s2036_s23 = scalar_select %p1618_p1, 1, 0 }
   0xd   : > { %s2037_s24 = scalar_select %p1622_p2, 1, 0 }
   0xe   : > { %p1628_p4 = por %p1618_p1, %p59_p0  ;;  %p1134_p5 = scmp.ge.s32.totalorder %s1549_s20, 1 }
   0xf   : > { %p1633_p6 = por %p136_p3, %p59_p0  ;;  %p169_p7 = scmp.lt.s32.totalorder %s1549_s20, 3 }
  0x10   : > { %s2038_s25 = scalar_select %p1628_p4, 1, 0 }
  0x11   : > { %s2039_s26 = scalar_select %p1633_p6, 1, 0 }
  0x12   : > { %p1638_p8 = pnand %p1134_p5, %p169_p7  ;;  %s1551_s28 = smov [#allocation6]  }
  0x13   : > { %s184_s29 = sshll.u32 %s1551_s28, 4  ;;  %s37_s5 = sadd.s32 1, %s1545_s19  ;;  %s185_s29 = int_to_ptr.vmem [resolvable:$true] %s184_s29 }
  0x14   : > { %s2040_s27 = scalar_select %p1638_p8, 1, 0 }
  0x15   : > { %p1277_p9 = pneg %p1638_p8  ;;  %s1373_s8 = scalar_lea.hbm %s2028_s1, 1024 }
  0x16   : > { %p1374_p12 = scmp.ne.s32.totalorder %s2028_s1, %s1373_s8  ;;  %p1380_p5 = scmp.lt.u32.totalorder %s1373_s8, %s2028_s1 }
  0x17   : > { %p1647_p11 = pnand %p1277_p9, %p1618_p1 }
  0x19   : > { %p1375_p13 = pneg %p1647_p11 }
  0x1b   : > { %p1376_p0 = pnand %p1375_p13, %p1374_p12 }
  0x1d   : > { %p1377_p3 = pneg %p1376_p0 }
  0x1f   : > { %p1382_p7 = pnand %p1380_p5, %p1377_p3 }
  0x21   : > { %1385 = shalt.err (!%p1382_p7)
}
  0x22   : > { %s1386_s13 = scalar_lea.vmem %s185_s29, 1024  ;;  %p1394_p1 = scmp.lt.s32.totalorder %s185_s29, %s185_s29 }
  0x23   : > { %p1387_p9 = scmp.ne.s32.totalorder %s185_s29, %s1386_s13  ;;  %p1395_p4 = scmp.lt.s32.totalorder %s1386_s13, %s1386_s13 }
  0x25   : > { %p1389_p10 = pnand %p1387_p9, %p1375_p13  ;;  %p1396_p8 = por %p1395_p4, %p1394_p1 }
  0x27   : > { %p1390_p6 = pneg %p1389_p10 }
  0x29   : > { %p1397_p2 = pnand %p1396_p8, %p1390_p6 }
  0x2b   : > { %1400 = shalt.err (!%p1397_p2)
}
  0x2c   : > { %s1552_s14 = smov 64   ;;  %s1553_s21 = smov 4  }
  0x2d   : > { %1280 = dma.hbm_to_vmem [thread:$0]  (!%p1647_p11), %s2028_s1, 1024, %s185_s29, [#allocation7], %s1552_s14, %s1552_s14, %s1553_s21  }
  0x2e   : > { %p39_p1 = scmp.ge.s32.totalorder %s37_s5, 2  ;;  %s46_s6 = sadd.s32 1, %s1537_s17 }
  0x2f   : > { %p53_p2 = scmp.ne.s32.totalorder %s1537_s17, %s1533_s16  ;;  %p54_p4 = scmp.eq.s32.totalorder %s1549_s20, 0 }
  0x30   : > { %s2057_s5 = smov (%p39_p1, %s37_s5), 0  ;;  %p2043_p8 = scmp.ne.s32.totalorder %s2037_s24, 0 }
  0x31   : > { %p1677_p6 = por %p54_p4, %p53_p2  ;;  %s41_s8 = ssub.s32 %s1545_s19, %s2057_s5 }
  0x32   : > { %p1683_p10 = por %p2043_p8, %p53_p2  ;;  %p1293_p12 = scmp.lt.s32.totalorder %s1549_s20, 2 }
  0x33   : > { %p44_p11 = scmp.eq.s32.totalorder %s41_s8, 0  ;;  %s201_s29 = sand.u32 1, %s1537_s17  }
  0x34   : > { %s1137_s9 = sshll.u32 %s201_s29, 7  ;;  %s1177_s11 = sshll.u32 %s1545_s19, 11 }
  0x35   : > { %s1692_s10 = scalar_select %p44_p11, %s1537_s17, %s46_s6  }
  0x36   : > { %s1698_s22 = scalar_lea.hbm %s2027_s0, %s1177_s11  ;;  %s205_s24 = scalar_lea.vmem [#allocation3], %s1137_s9 }
  0x37   : > { %s213_s28 = sshll.u32 %s205_s24, 4  ;;  %p1704_p13 = pnand %p1293_p12, %p1677_p6  ;;  %s1700_s28 = int_to_ptr.vmem [resolvable:$true] %s213_s28 }
  0x38   : > { %s1708_s6 = scalar_lea.sflag [#allocation4], %s201_s29  ;;  %s1401_s12 = scalar_lea.hbm %s1698_s22, 2048 }
  0x39   : > { %p1402_p0 = scmp.ne.s32.totalorder %s1698_s22, %s1401_s12  ;;  %p1403_p3 = pneg %p1704_p13 }
  0x3a   : > { %s1406_s7 = scalar_lea.hbm %s2027_s0, 4096  ;;  %p1407_p9 = scmp.lt.u32.totalorder %s1698_s22, %s2027_s0 }
  0x3b   : > { %p1404_p5 = pnand %p1403_p3, %p1402_p0  ;;  %p1408_p1 = scmp.lt.u32.totalorder %s1406_s7, %s1401_s12 }
  0x3c   : > { %p1410_p4 = scmp.lt.u32.totalorder %s1401_s12, %s1698_s22 }
  0x3d   : > { %p1405_p7 = pneg %p1404_p5  ;;  %p1409_p2 = por %p1408_p1, %p1407_p9 }
  0x3f   : > { %p1411_p6 = por %p1410_p4, %p1409_p2 }
  0x41   : > { %p1412_p8 = pnand %p1411_p6, %p1405_p7 }
  0x43   : > { %1415 = shalt.err (!%p1412_p8)
}
  0x44   : > { %s1416_s29 = scalar_lea.vmem %s1700_s28, 2048  ;;  %s1554_s9 = smov [#allocation3]  }
  0x45   : > { %p1417_p12 = scmp.ne.s32.totalorder %s1700_s28, %s1416_s29  ;;  %s1421_s11 = sshll.u32 %s1554_s9, 4  ;;  %s1422_s11 = int_to_ptr.vmem [resolvable:$false] %s1421_s11 }
  0x46   : > { %s1423_s13 = scalar_lea.vmem %s1422_s11, 4096  ;;  %p1424_p5 = scmp.lt.s32.totalorder %s1700_s28, %s1422_s11 }
  0x47   : > { %p1419_p11 = pnand %p1417_p12, %p1403_p3  ;;  %p1425_p9 = scmp.lt.s32.totalorder %s1423_s13, %s1416_s29 }
  0x49   : > { %p1420_p0 = pneg %p1419_p11  ;;  %p1426_p1 = por %p1425_p9, %p1424_p5 }
  0x4b   : > { %p1427_p2 = pnand %p1426_p1, %p1420_p0 }
  0x4d   : > { %1430 = shalt.err (!%p1427_p2)
}
  0x4e   : > { %1284 = dma.hbm_to_vmem [thread:$0]  (!%p1704_p13), %s1698_s22, 2048, %s1700_s28, %s1708_s6, %s1552_s14, %s1552_s14, %s1553_s21  }
  0x4f   : > { %p2046_p3 = scmp.ne.s32.totalorder %s2040_s27, 0 }
  0x50   : > { %s1742_s12 = sand.u32 (!%p2046_p3), 1, %s1533_s16   ;;  %p2047_p7 = scmp.ne.s32.totalorder (!%p2046_p3), %s2038_s25, 0 }
  0x51   : > { %225 = sbr.rel (%p2046_p3) target bundleno = 445 (0x1bd), region = 32  ;;  %s1141_s7 = sshll.u32 (!%p2046_p3), %s1742_s12, 7 }
  0x52   : > { %s228_s24 = scalar_lea.sflag (!%p2046_p3), [#allocation4], %s1742_s12  ;;  %s1746_s29 = scalar_lea.vmem (!%p2046_p3), [#allocation3], %s1141_s7 }
  0x58   : > { %1512 = dma.done.wait (%p2047_p7), %s228_s24, 2048  }
  0x59   : > { %1514 = vsyncadd (%p2047_p7), %s228_s24, 4294965248  ;;  %p2048_p13 = scmp.ne.s32.totalorder %s2036_s23, 0 }
  0x5b   : > { %1516 = dma.done.wait (%p2048_p13), [#allocation7], 1024  }
  0x5c   : > { %1518 = vsyncadd (%p2048_p13), [#allocation7], 4294966272  ;;  %v1349_v0 = vld [vmem:[#allocation6] sm:$0xff]   ;;  %v1350_v1 = vld [vmem:[#allocation6 + $0x8] sm:$0xff]   ;;  %s1143_s23 = sshll.u32 %s1742_s12, 8  ;;  %s1178_s21 = sshll.u32 %s1541_s18, 12 }
  0x5d   : > { %1203 = vmatprep.subr.bf16.mxu0 %v1349_v0  ;;  %1251 = vmatprep.subr.bf16.mxu1 %v1349_v0  ;;  %v1351_v2 = vld [vmem:[#allocation6 + $0x10] sm:$0xff]   ;;  %v1352_v3 = vld [vmem:[#allocation6 + $0x18] sm:$0xff]   ;;  %v1357_v4 = vld [vmem:[%s1746_s29] sm:$0xff]   ;;  %s1786_s14 = scalar_lea.vmem [#allocation8], %s1143_s23  ;;  %s1888_s6 = scalar_lea.hbm %s2030_s3, %s1178_s21 }
  0x5e   : > { %1204 = vmatpush3.bf16.msra.mxu0 %v1349_v0  ;;  %1259 = vmatpush3.bf16.msra.mxu1 %v1349_v0  ;;  %v1353_v5 = vld [vmem:[#allocation6 + $0x20] sm:$0xff]   ;;  %v1354_v6 = vld [vmem:[#allocation6 + $0x28] sm:$0xff]   ;;  %v1355_v8 = vld [vmem:[#allocation6 + $0x30] sm:$0xff]   ;;  %s992_s22 = sshll.u32 %s1786_s14, 4  ;;  %s974_s9 = scalar_lea.sflag [#allocation5], %s1742_s12  ;;  %s1890_s22 = int_to_ptr.vmem [resolvable:$true] %s992_s22 }
  0x5f   : > { %1205 = vmatprep.subr.bf16.mxu0 %v1350_v1  ;;  %1252 = vmatprep.subr.bf16.mxu1 %v1350_v1  ;;  %v1365_v7 = vld [vmem:[%s1746_s29 + $0x40] sm:$0xff]   ;;  %v1356_v9 = vld [vmem:[#allocation6 + $0x38] sm:$0xff]   ;;  %v1358_v10 = vld [vmem:[%s1746_s29 + $0x8] sm:$0xff]   ;;  %s1431_s11 = scalar_lea.vmem %s1890_s22, 4096  ;;  %s1555_s13 = smov [#allocation8]  }
  0x60   : > { %1219 = vmatprep.mubr.bf16.mxu0 %v1357_v4  ;;  %1235 = vmatprep.mubr.bf16.mxu1 %v1365_v7  ;;  %v1366_v11 = vld [vmem:[%s1746_s29 + $0x48] sm:$0xff]   ;;  %v1359_v12 = vld [vmem:[%s1746_s29 + $0x10] sm:$0xff]   ;;  %v1360_v14 = vld [vmem:[%s1746_s29 + $0x18] sm:$0xff]   ;;  %p1432_p4 = scmp.ne.s32.totalorder %s1890_s22, %s1431_s11  ;;  %s1435_s7 = sshll.u32 %s1555_s13, 4  ;;  %s1436_s7 = int_to_ptr.vmem [resolvable:$false] %s1435_s7 }
  0x61   : > { %v1367_v13 = vld [vmem:[%s1746_s29 + $0x50] sm:$0xff]   ;;  %v1368_v15 = vld [vmem:[%s1746_s29 + $0x58] sm:$0xff]   ;;  %v1361_v16 = vld [vmem:[%s1746_s29 + $0x20] sm:$0xff]   ;;  %s1437_s24 = scalar_lea.vmem %s1436_s7, 8192  ;;  %p1438_p12 = scmp.lt.s32.totalorder %s1890_s22, %s1436_s7 }
  0x62   : > { %1206 = vmatpush3.bf16.msra.mxu0 %v1350_v1  ;;  %1260 = vmatpush3.bf16.msra.mxu1 %v1350_v1  ;;  %v1369_v17 = vld [vmem:[%s1746_s29 + $0x60] sm:$0xff]   ;;  %v1362_v18 = vld [vmem:[%s1746_s29 + $0x28] sm:$0xff]   ;;  %v1363_v20 = vld [vmem:[%s1746_s29 + $0x30] sm:$0xff]   ;;  %p1433_p6 = pnand %p1432_p4, %p1683_p10  ;;  %p1439_p11 = scmp.lt.s32.totalorder %s1437_s24, %s1431_s11 }
  0x63   : > { %1207 = vmatprep.subr.bf16.mxu0 %v1351_v2  ;;  %1253 = vmatprep.subr.bf16.mxu1 %v1351_v2  ;;  %v1370_v19 = vld [vmem:[%s1746_s29 + $0x68] sm:$0xff]   ;;  %v1371_v21 = vld [vmem:[%s1746_s29 + $0x70] sm:$0xff]   ;;  %v1364_v22 = vld [vmem:[%s1746_s29 + $0x38] sm:$0xff]  }
  0x64   : > { %v1372_v23 = vld [vmem:[%s1746_s29 + $0x78] sm:$0xff]   ;;  %v1776_v24 = vld [vmem:[%s2029_s2] ss:$0 sm:$0xff]  ;;  %p1434_p8 = pneg %p1433_p6  ;;  %p1440_p0 = por %p1439_p11, %p1438_p12 }
  0x66   : > { %1208 = vmatpush3.bf16.msra.mxu0 %v1351_v2  ;;  %1261 = vmatpush3.bf16.msra.mxu1 %v1351_v2  ;;  %p1441_p5 = pnand %p1440_p0, %p1434_p8 }
  0x67   : > { %1209 = vmatprep.subr.bf16.mxu0 %v1352_v3  ;;  %1254 = vmatprep.subr.bf16.mxu1 %v1352_v3 }
  0x6a   : > { %1210 = vmatpush3.bf16.msra.mxu0 %v1352_v3  ;;  %1262 = vmatpush3.bf16.msra.mxu1 %v1352_v3 }
  0x6b   : > { %1211 = vmatprep.subr.bf16.mxu0 %v1353_v5  ;;  %1255 = vmatprep.subr.bf16.mxu1 %v1353_v5 }
  0x6e   : > { %1212 = vmatpush3.bf16.msra.mxu0 %v1353_v5  ;;  %1263 = vmatpush3.bf16.msra.mxu1 %v1353_v5 }
  0x6f   : > { %1213 = vmatprep.subr.bf16.mxu0 %v1354_v6  ;;  %1256 = vmatprep.subr.bf16.mxu1 %v1354_v6 }
  0x72   : > { %1214 = vmatpush3.bf16.msra.mxu0 %v1354_v6  ;;  %1264 = vmatpush3.bf16.msra.mxu1 %v1354_v6 }
  0x73   : > { %1215 = vmatprep.subr.bf16.mxu0 %v1355_v8  ;;  %1257 = vmatprep.subr.bf16.mxu1 %v1355_v8 }
  0x76   : > { %1216 = vmatpush3.bf16.msra.mxu0 %v1355_v8  ;;  %1265 = vmatpush3.bf16.msra.mxu1 %v1355_v8 }
  0x77   : > { %1217 = vmatprep.subr.bf16.mxu0 %v1356_v9  ;;  %1258 = vmatprep.subr.bf16.mxu1 %v1356_v9 }
  0x7a   : > { %1218 = vmatpush3.bf16.msra.mxu0 %v1356_v9  ;;  %1266 = vmatpush3.bf16.msra.mxu1 %v1356_v9 }
  0x7d   : > { %1220 = vmatmul.mubr.bf16.vlgmr.msra.gmra.mrb[0].mxu0 %v1358_v10  ;;  %1236 = vmatmul.mubr.bf16.vlgmr.msra.gmra.mrb[0].mxu1 %v1366_v11 }
  0x7e   : > { %1223 = vmatprep.mubr.bf16.mxu0 %v1359_v12  ;;  %1239 = vmatprep.mubr.bf16.mxu1 %v1367_v13 }
  0x85   : > { %1224 = vmatmul.mubr.bf16.gmra.mrb[4].mxu0 %v1360_v14  ;;  %1240 = vmatmul.mubr.bf16.gmra.mrb[4].mxu1 %v1368_v15 }
  0x86   : > { %1227 = vmatprep.mubr.bf16.mxu0 %v1361_v16  ;;  %1243 = vmatprep.mubr.bf16.mxu1 %v1369_v17 }
  0x8d   : > { %1228 = vmatmul.mubr.bf16.gmra.mrb[8].mxu0 %v1362_v18  ;;  %1244 = vmatmul.mubr.bf16.gmra.mrb[8].mxu1 %v1370_v19 }
  0x8e   : > { %1231 = vmatprep.mubr.bf16.mxu0 %v1363_v20  ;;  %1247 = vmatprep.mubr.bf16.mxu1 %v1371_v21 }
  0x95   : > { %1232 = vmatmul.mubr.bf16.gmra.mrb[12].mxu0 %v1364_v22  ;;  %1248 = vmatmul.mubr.bf16.gmra.mrb[12].mxu1 %v1372_v23 }
 0x150   : > { %v1221_v25 = vpop.f32.mrb[0].mxu0  ;;  %v1237_v26 = vpop.f32.mrb[0].mxu1 }
 0x151   : > { %v798_v27 = vadd.f32 %v1221_v25, %v1776_v24  ;;  %v563_v28 = vpop.f32.mrb[1].mxu0  ;;  %v1780_v29 = vadd.f32 %v1237_v26, %v1776_v24  ;;  %v627_v30 = vpop.f32.mrb[1].mxu1 }
 0x152   : > { %v796_v31 = vadd.f32 %v1776_v24, %v563_v28  ;;  %v1222_v32 = vpop.f32.mrb[2].mxu0  ;;  %v1784_v33 = vadd.f32 %v1776_v24, %v627_v30  ;;  %v1238_v34 = vpop.f32.mrb[2].mxu1 }
 0x153   : > { %830 = vst [vmem:[%s1786_s14 + $0x10] sm:$0xff] %v798_v27  ;;  %v799_v35 = vadd.f32 %v1222_v32, %v1776_v24  ;;  %v566_v36 = vpop.f32.mrb[3].mxu0  ;;  %846 = vst [vmem:[%s1786_s14 + $0x90] sm:$0xff] %v1780_v29  ;;  %v1793_v37 = vadd.f32 %v1238_v34, %v1776_v24  ;;  %v630_v38 = vpop.f32.mrb[3].mxu1  ;;  %v899_v44 = vmul.f32 %v798_v27, %v798_v27 }
 0x154   : > { %828 = vst [vmem:[%s1786_s14] sm:$0xff] %v796_v31  ;;  %v797_v39 = vadd.f32 %v1776_v24, %v566_v36  ;;  %844 = vst [vmem:[%s1786_s14 + $0x80] sm:$0xff] %v1784_v33  ;;  %v1800_v40 = vadd.f32 %v1776_v24, %v630_v38  ;;  %v897_v41 = vmul.f32 %v796_v31, %v796_v31 }
 0x155   : > { %831 = vst [vmem:[%s1786_s14 + $0x18] sm:$0xff] %v799_v35  ;;  %847 = vst [vmem:[%s1786_s14 + $0x98] sm:$0xff] %v1793_v37  ;;  %v900_v49 = vmul.f32 %v799_v35, %v799_v35 }
 0x156   : > { %829 = vst [vmem:[%s1786_s14 + $0x8] sm:$0xff] %v797_v39  ;;  %v860_v42 = vadd.f32 %v797_v39, %v796_v31  ;;  %v898_v43 = vmul.f32 %v797_v39, %v797_v39  ;;  %845 = vst [vmem:[%s1786_s14 + $0x88] sm:$0xff] %v1800_v40 }
 0x158   : > { %v861_v45 = vadd.f32 %v860_v42, %v798_v27  ;;  %v929_v46 = vadd.f32 %v898_v43, %v897_v41  ;;  %v1225_v47 = vpop.f32.mrb[4].mxu0  ;;  %v1241_v48 = vpop.f32.mrb[4].mxu1 }
 0x159   : > { %v802_v50 = vadd.f32 %v1225_v47, %v1776_v24  ;;  %v579_v51 = vpop.f32.mrb[5].mxu0  ;;  %v1810_v52 = vadd.f32 %v1241_v48, %v1776_v24  ;;  %v643_v53 = vpop.f32.mrb[5].mxu1 }
 0x15a   : > { %v930_v54 = vadd.f32 %v929_v46, %v899_v44  ;;  %v800_v55 = vadd.f32 %v1776_v24, %v579_v51  ;;  %v862_v56 = vadd.f32 %v861_v45, %v799_v35  ;;  %v1226_v57 = vpop.f32.mrb[6].mxu0  ;;  %v1814_v58 = vadd.f32 %v1776_v24, %v643_v53  ;;  %v1242_v59 = vpop.f32.mrb[6].mxu1 }
 0x15b   : > { %834 = vst [vmem:[%s1786_s14 + $0x30] sm:$0xff] %v802_v50  ;;  %v803_v60 = vadd.f32 %v1226_v57, %v1776_v24  ;;  %v582_v61 = vpop.f32.mrb[7].mxu0  ;;  %850 = vst [vmem:[%s1786_s14 + $0xb0] sm:$0xff] %v1810_v52  ;;  %v1821_v62 = vadd.f32 %v1242_v59, %v1776_v24  ;;  %v646_v63 = vpop.f32.mrb[7].mxu1  ;;  %v903_v8 = vmul.f32 %v802_v50, %v802_v50 }
 0x15c   : > { %832 = vst [vmem:[%s1786_s14 + $0x20] sm:$0xff] %v800_v55  ;;  %v863_v0 = vadd.f32 %v862_v56, %v800_v55  ;;  %v901_v1 = vmul.f32 %v800_v55, %v800_v55  ;;  %v931_v2 = vadd.f32 %v930_v54, %v900_v49  ;;  %v801_v3 = vadd.f32 %v1776_v24, %v582_v61 }
 0x15d   : > { %848 = vst [vmem:[%s1786_s14 + $0xa0] sm:$0xff] %v1814_v58  ;;  %835 = vst [vmem:[%s1786_s14 + $0x38] sm:$0xff] %v803_v60  ;;  %v1831_v4 = vadd.f32 %v1776_v24, %v646_v63  ;;  %v904_v13 = vmul.f32 %v803_v60, %v803_v60 }
 0x15e   : > { %851 = vst [vmem:[%s1786_s14 + $0xb8] sm:$0xff] %v1821_v62  ;;  %v932_v5 = vadd.f32 %v931_v2, %v901_v1  ;;  %833 = vst [vmem:[%s1786_s14 + $0x28] sm:$0xff] %v801_v3  ;;  %v864_v6 = vadd.f32 %v863_v0, %v801_v3  ;;  %v902_v7 = vmul.f32 %v801_v3, %v801_v3 }
 0x15f   : > { %849 = vst [vmem:[%s1786_s14 + $0xa8] sm:$0xff] %v1831_v4 }
 0x160   : > { %v865_v9 = vadd.f32 %v864_v6, %v802_v50  ;;  %v933_v10 = vadd.f32 %v932_v5, %v902_v7  ;;  %v1229_v11 = vpop.f32.mrb[8].mxu0  ;;  %v1245_v12 = vpop.f32.mrb[8].mxu1 }
 0x161   : > { %v806_v14 = vadd.f32 %v1229_v11, %v1776_v24  ;;  %v595_v15 = vpop.f32.mrb[9].mxu0  ;;  %v1838_v16 = vadd.f32 %v1245_v12, %v1776_v24  ;;  %v659_v17 = vpop.f32.mrb[9].mxu1 }
 0x162   : > { %v934_v18 = vadd.f32 %v933_v10, %v903_v8  ;;  %v804_v19 = vadd.f32 %v1776_v24, %v595_v15  ;;  %v866_v20 = vadd.f32 %v865_v9, %v803_v60  ;;  %v1230_v21 = vpop.f32.mrb[10].mxu0  ;;  %v1842_v22 = vadd.f32 %v1776_v24, %v659_v17  ;;  %v1246_v23 = vpop.f32.mrb[10].mxu1 }
 0x163   : > { %838 = vst [vmem:[%s1786_s14 + $0x50] sm:$0xff] %v806_v14  ;;  %v807_v25 = vadd.f32 %v1230_v21, %v1776_v24  ;;  %v598_v26 = vpop.f32.mrb[11].mxu0  ;;  %854 = vst [vmem:[%s1786_s14 + $0xd0] sm:$0xff] %v1838_v16  ;;  %v1849_v27 = vadd.f32 %v1246_v23, %v1776_v24  ;;  %v662_v28 = vpop.f32.mrb[11].mxu1  ;;  %v907_v41 = vmul.f32 %v806_v14, %v806_v14 }
 0x164   : > { %836 = vst [vmem:[%s1786_s14 + $0x40] sm:$0xff] %v804_v19  ;;  %v867_v30 = vadd.f32 %v866_v20, %v804_v19  ;;  %v905_v31 = vmul.f32 %v804_v19, %v804_v19  ;;  %v935_v32 = vadd.f32 %v934_v18, %v904_v13  ;;  %v805_v34 = vadd.f32 %v1776_v24, %v598_v26 }
 0x165   : > { %852 = vst [vmem:[%s1786_s14 + $0xc0] sm:$0xff] %v1842_v22  ;;  %839 = vst [vmem:[%s1786_s14 + $0x58] sm:$0xff] %v807_v25  ;;  %v1859_v35 = vadd.f32 %v1776_v24, %v662_v28  ;;  %v908_v46 = vmul.f32 %v807_v25, %v807_v25 }
 0x166   : > { %855 = vst [vmem:[%s1786_s14 + $0xd8] sm:$0xff] %v1849_v27  ;;  %v936_v36 = vadd.f32 %v935_v32, %v905_v31  ;;  %837 = vst [vmem:[%s1786_s14 + $0x48] sm:$0xff] %v805_v34  ;;  %v868_v38 = vadd.f32 %v867_v30, %v805_v34  ;;  %v906_v39 = vmul.f32 %v805_v34, %v805_v34 }
 0x167   : > { %853 = vst [vmem:[%s1786_s14 + $0xc8] sm:$0xff] %v1859_v35 }
 0x168   : > { %v869_v42 = vadd.f32 %v868_v38, %v806_v14  ;;  %v937_v43 = vadd.f32 %v936_v36, %v906_v39  ;;  %v1233_v44 = vpop.f32.mrb[12].mxu0  ;;  %v1249_v45 = vpop.f32.mrb[12].mxu1 }
 0x169   : > { %v810_v47 = vadd.f32 %v1233_v44, %v1776_v24  ;;  %v611_v48 = vpop.f32.mrb[13].mxu0  ;;  %v1866_v49 = vadd.f32 %v1249_v45, %v1776_v24  ;;  %v675_v50 = vpop.f32.mrb[13].mxu1 }
 0x16a   : > { %v938_v51 = vadd.f32 %v937_v43, %v907_v41  ;;  %v808_v53 = vadd.f32 %v1776_v24, %v611_v48  ;;  %v870_v54 = vadd.f32 %v869_v42, %v807_v25  ;;  %v1234_v55 = vpop.f32.mrb[14].mxu0  ;;  %v1872_v56 = vadd.f32 %v1776_v24, %v675_v50  ;;  %v1250_v57 = vpop.f32.mrb[14].mxu1 }
 0x16b   : > { %842 = vst [vmem:[%s1786_s14 + $0x70] sm:$0xff] %v810_v47  ;;  %v811_v59 = vadd.f32 %v1234_v55, %v1776_v24  ;;  %v614_v60 = vpop.f32.mrb[15].mxu0  ;;  %858 = vst [vmem:[%s1786_s14 + $0xf0] sm:$0xff] %v1866_v49  ;;  %v1879_v61 = vadd.f32 %v1250_v57, %v1776_v24  ;;  %v678_v63 = vpop.f32.mrb[15].mxu1  ;;  %v911_v9 = vmul.f32 %v810_v47, %v810_v47 }
 0x16c   : > { %840 = vst [vmem:[%s1786_s14 + $0x60] sm:$0xff] %v808_v53  ;;  %v871_v0 = vadd.f32 %v870_v54, %v808_v53  ;;  %v909_v1 = vmul.f32 %v808_v53, %v808_v53  ;;  %v939_v2 = vadd.f32 %v938_v51, %v908_v46  ;;  %v809_v3 = vadd.f32 %v1776_v24, %v614_v60 }
 0x16d   : > { %856 = vst [vmem:[%s1786_s14 + $0xe0] sm:$0xff] %v1872_v56  ;;  %843 = vst [vmem:[%s1786_s14 + $0x78] sm:$0xff] %v811_v59  ;;  %v1896_v5 = vadd.f32 %v1776_v24, %v678_v63 }
 0x16e   : > { %859 = vst [vmem:[%s1786_s14 + $0xf8] sm:$0xff] %v1879_v61  ;;  %v940_v6 = vadd.f32 %v939_v2, %v909_v1  ;;  %841 = vst [vmem:[%s1786_s14 + $0x68] sm:$0xff] %v809_v3  ;;  %v872_v7 = vadd.f32 %v871_v0, %v809_v3  ;;  %v910_v8 = vmul.f32 %v809_v3, %v809_v3 }
 0x16f   : > { %857 = vst [vmem:[%s1786_s14 + $0xe8] sm:$0xff] %v1896_v5 }
 0x170   : > { %v873_v10 = vadd.f32 %v872_v7, %v810_v47  ;;  %v941_v11 = vadd.f32 %v940_v6, %v910_v8 }
 0x171   : > { %1444 = shalt.err (!%p1441_p5)
}
 0x172   : > { %s1445_s29 = scalar_lea.hbm %s1888_s6, 4096  ;;  %s1449_s27 = scalar_lea.hbm %s2030_s3, 8192 }
 0x173   : > { %p1446_p9 = scmp.ne.s32.totalorder %s1888_s6, %s1445_s29  ;;  %p1450_p3 = scmp.lt.u32.totalorder %s1888_s6, %s2030_s3 }
 0x174   : > { %p1451_p7 = scmp.lt.u32.totalorder %s1449_s27, %s1445_s29  ;;  %p1453_p4 = scmp.lt.u32.totalorder %s1445_s29, %s1888_s6 }
 0x175   : > { %p1447_p1 = pnand %p1446_p9, %p1683_p10 }
 0x176   : > { %p1452_p13 = por %p1451_p7, %p1450_p3 }
 0x177   : > { %p1448_p2 = pneg %p1447_p1 }
 0x178   : > { %p1454_p6 = por %p1453_p4, %p1452_p13 }
 0x17a   : > { %p1455_p8 = pnand %p1454_p6, %p1448_p2 }
 0x17c   : > { %1458 = shalt.err (!%p1455_p8)
}
 0x17d   : > { %s1556_s28 = smov 128   ;;  %s1557_s8 = smov 8   ;;  %v912_v24 = vmul.f32 %v811_v59, %v811_v59  ;;  %v942_v12 = vadd.f32 %v941_v11, %v911_v9  ;;  %v874_v13 = vadd.f32 %v873_v10, %v811_v59  ;;  %v913_v14 = vmul.f32 %v1784_v33, %v1784_v33 }
 0x17e   : > { %1273 = dma.vmem_to_hbm [thread:$0]  (%p1683_p10), %s1890_s22, 4096, %s1888_s6, %s974_s9, %s1556_s28, %s1556_s28, %s1557_s8   ;;  %v914_v20 = vmul.f32 %v1800_v40, %v1800_v40  ;;  %v915_v21 = vmul.f32 %v1780_v29, %v1780_v29  ;;  %v916_v26 = vmul.f32 %v1793_v37, %v1793_v37  ;;  %v918_v36 = vmul.f32 %v1831_v4, %v1831_v4 }
 0x17f   : > { %v875_v15 = vadd.f32 %v874_v13, %v1784_v33  ;;  %v943_v17 = vadd.f32 %v942_v12, %v912_v24  ;;  %v917_v33 = vmul.f32 %v1814_v58, %v1814_v58  ;;  %v922_v46 = vmul.f32 %v1859_v35, %v1859_v35  ;;  %s1144_s22 = sshll.u32 %s1742_s12, 3  ;;  %s1174_s6 = sshll.u32 %s1541_s18, 7 }
 0x180   : > { %v927_v57 = vmul.f32 %v1866_v49, %v1866_v49  ;;  %v966_v6 = vlaneseq  ;;  %s264_s9 = scalar_lea.vmem [#allocation9], %s1144_s22  ;;  %s1978_s24 = scalar_lea.hbm %s2031_s4, %s1174_s6 }
 0x181   : > { %v944_v18 = vadd.f32 %v943_v17, %v913_v14  ;;  %v876_v19 = vadd.f32 %v875_v15, %v1800_v40  ;;  %s1008_s11 = sshll.u32 %s264_s9, 4  ;;  %s979_s29 = scalar_lea.sflag [#allocation10], %s1742_s12  ;;  %s1980_s11 = int_to_ptr.vmem [resolvable:$true] %s1008_s11 }
 0x182   : > { %v967_v10 = vshrl.u32 %v966_v6, 7  ;;  %s1459_s18 = scalar_lea.vmem %s1980_s11, 128  ;;  %s1558_s23 = smov [#allocation9]  }
 0x183   : > { %v877_v23 = vadd.f32 %v876_v19, %v1780_v29  ;;  %v945_v25 = vadd.f32 %v944_v18, %v914_v20  ;;  %v919_v29 = vmul.f32 %v1810_v52, %v1810_v52  ;;  %p1460_p12 = scmp.ne.s32.totalorder %s1980_s11, %s1459_s18  ;;  %s1463_s25 = sshll.u32 %s1558_s23, 4  ;;  %s1464_s25 = int_to_ptr.vmem [resolvable:$false] %s1463_s25 }
 0x184   : > { %vm969_vm0 = vcmp.eq.s32.totalorder %v967_v10, 1  ;;  %vm968_vm1 = vcmp.eq.s32.totalorder %v967_v10, 0  ;;  %s1465_s27 = scalar_lea.vmem %s1464_s25, 256  ;;  %p1466_p5 = scmp.lt.s32.totalorder %s1980_s11, %s1464_s25 }
 0x185   : > { %v946_v28 = vadd.f32 %v945_v25, %v915_v21  ;;  %v878_v30 = vadd.f32 %v877_v23, %v1793_v37  ;;  %v920_v37 = vmul.f32 %v1821_v62, %v1821_v62  ;;  %p1461_p11 = pnand %p1460_p12, %p1683_p10  ;;  %p1467_p9 = scmp.lt.s32.totalorder %s1465_s27, %s1459_s18 }
 0x187   : > { %v879_v31 = vadd.f32 %v878_v30, %v1814_v58  ;;  %v947_v32 = vadd.f32 %v946_v28, %v916_v26  ;;  %v921_v58 = vmul.f32 %v1842_v22, %v1842_v22  ;;  %p1462_p0 = pneg %p1461_p11  ;;  %p1468_p1 = por %p1467_p9, %p1466_p5 }
 0x189   : > { %v948_v34 = vadd.f32 %v947_v32, %v917_v33  ;;  %v880_v40 = vadd.f32 %v879_v31, %v1831_v4  ;;  %p1469_p2 = pnand %p1468_p1, %p1462_p0 }
 0x18b   : > { %v881_v38 = vadd.f32 %v880_v40, %v1810_v52  ;;  %v949_v39 = vadd.f32 %v948_v34, %v918_v36  ;;  %v923_v52 = vmul.f32 %v1838_v16, %v1838_v16 }
 0x18d   : > { %v950_v41 = vadd.f32 %v949_v39, %v919_v29  ;;  %v882_v42 = vadd.f32 %v881_v38, %v1821_v62  ;;  %v924_v62 = vmul.f32 %v1849_v27, %v1849_v27 }
 0x18f   : > { %v883_v43 = vadd.f32 %v882_v42, %v1842_v22  ;;  %v951_v44 = vadd.f32 %v950_v41, %v920_v37  ;;  %v925_v22 = vmul.f32 %v1872_v56, %v1872_v56 }
 0x191   : > { %v952_v45 = vadd.f32 %v951_v44, %v921_v58  ;;  %v884_v4 = vadd.f32 %v883_v43, %v1859_v35 }
 0x193   : > { %v885_v47 = vadd.f32 %v884_v4, %v1838_v16  ;;  %v953_v48 = vadd.f32 %v952_v45, %v922_v46  ;;  %v926_v16 = vmul.f32 %v1896_v5, %v1896_v5 }
 0x195   : > { %v954_v50 = vadd.f32 %v953_v48, %v923_v52  ;;  %v886_v51 = vadd.f32 %v885_v47, %v1849_v27  ;;  %v928_v27 = vmul.f32 %v1879_v61, %v1879_v61 }
 0x197   : > { %v887_v53 = vadd.f32 %v886_v51, %v1872_v56  ;;  %v955_v54 = vadd.f32 %v954_v50, %v924_v62 }
 0x199   : > { %v956_v55 = vadd.f32 %v955_v54, %v925_v22  ;;  %v888_v35 = vadd.f32 %v887_v53, %v1896_v5 }
 0x19b   : > { %v889_v59 = vadd.f32 %v888_v35, %v1866_v49  ;;  %v957_v60 = vadd.f32 %v956_v55, %v926_v16 }
 0x19d   : > { %v890_v63 = vadd.f32 %v889_v59, %v1879_v61  ;;  %v958_v56 = vadd.f32 %v957_v60, %v927_v57 }
 0x19f   : > { %v891_v0 = vrot.slane %v890_v63, 4  ;;  %v959_v1 = vadd.f32 %v958_v56, %v928_v27 }
 0x1a1   : > { %v892_v2 = vadd.f32 %v891_v0, %v890_v63  ;;  %v960_v3 = vrot.slane %v959_v1, 4 }
 0x1a3   : > { %v893_v7 = vrot.slane %v892_v2, 2  ;;  %v961_v5 = vadd.f32 %v960_v3, %v959_v1 }
 0x1a5   : > { %v894_v8 = vadd.f32 %v893_v7, %v892_v2  ;;  %v962_v9 = vrot.slane %v961_v5, 2 }
 0x1a7   : > { %v963_v49 = vadd.f32 %v962_v9, %v961_v5  ;;  %v895_v11 = vrot.slane %v894_v8, 1 }
 0x1a9   : > { %v964_v24 = vrot.slane %v963_v49, 1  ;;  %v896_v12 = vadd.f32 %v895_v11, %v894_v8 }
 0x1ab   : > { %v965_v61 = vadd.f32 %v964_v24, %v963_v49 }
 0x1ad   : > { %v970_v13 = vsel %vm969_vm0, %v965_v61, 0.0 }
 0x1ae   : > { %v971_v14 = vsel %vm968_vm1, %v896_v12, %v970_v13 }
 0x1af   : > { %972 = vst [vmem:[%s264_s9] sm:$0xff] %v971_v14 }
 0x1b0   : > { %1472 = shalt.err (!%p1469_p2)
}
 0x1b1   : > { %s1473_s12 = scalar_lea.hbm %s1978_s24, 128  ;;  %s1477_s28 = scalar_lea.hbm %s2031_s4, 256 }
 0x1b2   : > { %p1474_p3 = scmp.ne.s32.totalorder %s1978_s24, %s1473_s12  ;;  %p1478_p4 = scmp.lt.u32.totalorder %s1978_s24, %s2031_s4 }
 0x1b3   : > { %p1479_p6 = scmp.lt.u32.totalorder %s1477_s28, %s1473_s12  ;;  %p1481_p12 = scmp.lt.u32.totalorder %s1473_s12, %s1978_s24 }
 0x1b4   : > { %p1475_p7 = pnand %p1474_p3, %p1683_p10 }
 0x1b5   : > { %p1480_p8 = por %p1479_p6, %p1478_p4 }
 0x1b6   : > { %p1476_p13 = pneg %p1475_p7 }
 0x1b7   : > { %p1482_p11 = por %p1481_p12, %p1480_p8 }
 0x1b9   : > { %p1483_p0 = pnand %p1482_p11, %p1476_p13 }
 0x1bb   : > { %1486 = shalt.err (!%p1483_p0)
}
 0x1bc   : > { %1274 = dma.vmem_to_hbm [thread:$0]  (%p1683_p10), %s1980_s11, 128, %s1978_s24, %s979_s29  }
 0x1bd PF: > { %s1020_s6 = sand.u32 1, %s1529_s15   ;;  %p2049_p5 = scmp.ne.s32.totalorder %s2039_s26, 0 }
 0x1be   : > { %p2050_p9 = scmp.ge.s32.totalorder %s1549_s20, 2  ;;  %s1021_s9 = scalar_lea.sflag [#allocation5], %s1020_s6 }
 0x1c0   : > { %p1286_p1 = pnand %p2050_p9, %p2049_p5 }
 0x1c2   : > { %1520 = dma.done.wait (!%p1286_p1), %s1021_s9, 4096  }
 0x1c3   : > { %1522 = vsyncadd (!%p1286_p1), %s1021_s9, 4294963200  ;;  %s1030_s13 = scalar_lea.sflag [#allocation10], %s1020_s6 }
 0x1c4   : > { %1524 = dma.done.wait (!%p1286_p1), %s1030_s13, 128  }
 0x1c5   : > { %1526 = vsyncadd (!%p1286_p1), %s1030_s13, 4294967168  ;;  %s25_s20 = sadd.s32 1, %s1549_s20   ;;  %s2051_s15 = smov %s1533_s16 }
 0x1c6   : > { %p22_p2 = scmp.ge.s32.totalorder %s25_s20, 4   ;;  %s2052_s16 = smov %s1537_s17 }
 0x1c7   : > { %s2053_s17 = smov %s1692_s10  ;;  %s2054_s18 = smov %s1545_s19 }
 0x1c8   : > { %s2055_s19 = smov %s2057_s5  ;;  %24 = sbr.rel (!%p22_p2) target bundleno = 9 (0x9), region = 107 }
 0x1cf   :  { %1035 = vsyncpa [#allocation4], 1 }
 0x1d0   :  { %1037 = vsyncpa [#allocation4 + $0x1], 1 }
 0x1d1   :  { %1038 = vsyncpa [#allocation7], 1 }
 0x1d2   :  { %1039 = vsyncpa [#allocation5], 1 }
 0x1d3   :  { %1041 = vsyncpa [#allocation5 + $0x1], 1 }
 0x1d4   :  { %1042 = vsyncpa [#allocation10], 1 }
 0x1d5   :  { %1044 = vsyncpa [#allocation10 + $0x1], 1 }

</bundles_post_ra>
